<compile_context>
chip_gen: v6e
topology: v6e:2x2x1
jax: 0.10.0
libtpu: 0.0.40
codegen_flags: <defaults>
</compile_context>

<pallas_src>
import jax
import jax.numpy as jnp
from jax.experimental import pallas as pl
from jax.experimental.pallas import tpu as pltpu

_LANE = 128


def _round_up(x, m):
    return ((x + m - 1) // m) * m


def _make_critic_kernel(chunk, n_chunks):
    """Fused 3-layer MLP kernel.

    Ref layout (per grid step, TILE_B = batch tile, Dp = padded input dim):
      xt   : [Dp, TILE_B]   compute dtype (batch on the lane axis)
      w1t  : [H1, Dp]       compute dtype
      b1   : [H1, 1]  f32   w2t: [H2, H1] compute dtype   b2: [H2, 1] f32
      w3   : [H2, 1]  f32   b3 : [1, 1] f32
      o    : [1, TILE_B] f32 (lane-dense output row)
    """

    def kernel(xt_ref, w1t_ref, b1_ref, w2t_ref, b2_ref, w3_ref, b3_ref,
               o_ref):
        # Small weights: load once, stay in vregs / VMEM across chunks.
        w1t = w1t_ref[...]
        w2t = w2t_ref[...]
        b1 = b1_ref[...]
        b2 = b2_ref[...]
        w3 = w3_ref[...]
        b3 = b3_ref[...]

        @pl.loop(0, n_chunks)
        def _(c):
            col = pl.multiple_of(c * chunk, chunk)
            xc = xt_ref[:, pl.ds(col, chunk)]               # [Dp, chunk]

            # fc1: single MXU matmul, f32 accumulate; bias+ReLU+cast fused.
            h1 = jnp.dot(w1t, xc, preferred_element_type=jnp.float32)
            h1 = jnp.maximum(h1 + b1, 0.0).astype(w2t.dtype)  # [H1, chunk]

            # fc2: MXU matmul, f32 accumulate; bias+ReLU in f32 on the VPU.
            h2 = jnp.dot(w2t, h1, preferred_element_type=jnp.float32)
            h2 = jnp.maximum(h2 + b2, 0.0)                    # [H2, chunk]

            # fc3 (out_dim == 1): VPU multiply + sublane (XLU) reduction.
            row = jnp.sum(h2 * w3, axis=0, keepdims=True) + b3  # [1, chunk]
            o_ref[:, pl.ds(col, chunk)] = row.astype(o_ref.dtype)

    return kernel


def critic_forward(params, obs_n, act_n, *, tile_b=4096,
                   compute_dtype=jnp.bfloat16):
    """Same semantics as CriticModel.forward: concat(obs_n + act_n, dim=1),
    3-layer MLP (64/64/1) with ReLU, squeeze -> [B]."""
    xs = list(obs_n) + list(act_n)
    B = int(xs[0].shape[0])
    d_in = sum(int(x.shape[1]) for x in xs)

    w1, b1, w2, b2, w3, b3 = (params["w1"], params["b1"], params["w2"],
                              params["b2"], params["w3"], params["b3"])
    H1, H2 = int(w1.shape[1]), int(w2.shape[1])

    # ---- tile sizing ------------------------------------------------------
    b128 = _round_up(B, _LANE)
    cap = max(_LANE, (int(tile_b) // _LANE) * _LANE)
    if b128 > cap:
        tile = cap
    elif b128 >= 4 * _LANE:
        # Split into two tiles so both v7x TensorCores get work; costs one
        # extra ~0.35us grid step on single-TC v5e/v6e (negligible).
        tile = _round_up((b128 + 1) // 2, _LANE)
    else:
        tile = b128
    chunk = 256 if tile % 256 == 0 else _LANE
    n_chunks = tile // chunk
    b_pad = _round_up(B, tile)
    n_tiles = b_pad // tile

    # ---- operand packing (wrapper-side; tiny vs. total HBM traffic) --------
    d_pad = _round_up(d_in, 32)            # bf16 sublane packing & fewer pads
    x = jnp.concatenate([t.astype(compute_dtype) for t in xs], axis=1)
    if b_pad != B or d_pad != d_in:
        x = jnp.pad(x, ((0, b_pad - B), (0, d_pad - d_in)))
    xt = jnp.transpose(x)                                   # [d_pad, b_pad]

    w1t = jnp.transpose(w1)                                 # [H1, d_in]
    if d_pad != d_in:
        w1t = jnp.pad(w1t, ((0, 0), (0, d_pad - d_in)))     # zero cols
    w1t = w1t.astype(compute_dtype)
    w2t = jnp.transpose(w2).astype(compute_dtype)           # [H2, H1]
    b1_c = jnp.reshape(b1, (H1, 1)).astype(jnp.float32)
    b2_c = jnp.reshape(b2, (H2, 1)).astype(jnp.float32)
    w3_c = jnp.reshape(w3, (H2, 1)).astype(jnp.float32)
    b3_c = jnp.reshape(b3, (1, 1)).astype(jnp.float32)

    # ---- specs: activations march over the batch, weights stay resident ----
    in_specs = [
        pl.BlockSpec((d_pad, tile), lambda i: (0, i)),    # xt
        pl.BlockSpec((H1, d_pad), lambda i: (0, 0)),      # w1t
        pl.BlockSpec((H1, 1), lambda i: (0, 0)),          # b1
        pl.BlockSpec((H2, H1), lambda i: (0, 0)),         # w2t
        pl.BlockSpec((H2, 1), lambda i: (0, 0)),          # b2
        pl.BlockSpec((H2, 1), lambda i: (0, 0)),          # w3
        pl.BlockSpec((1, 1), lambda i: (0, 0)),           # b3
    ]
    out_spec = pl.BlockSpec((1, tile), lambda i: (0, i))

    itemsize = jnp.dtype(compute_dtype).itemsize
    param_bytes = (d_pad * H1 + H1 * H2) * itemsize + (H1 + 2 * H2 + 1) * 4
    cost = pl.CostEstimate(
        flops=int(2 * b_pad * (d_pad * H1 + H1 * H2 + H2)),
        transcendentals=0,
        bytes_accessed=int(b_pad * d_pad * itemsize + param_bytes
                           + b_pad * 4))

    out = pl.pallas_call(
        _make_critic_kernel(chunk, n_chunks),
        out_shape=jax.ShapeDtypeStruct((1, b_pad), jnp.float32),
        grid=(n_tiles,),
        in_specs=in_specs,
        out_specs=out_spec,
        compiler_params=pltpu.CompilerParams(
            dimension_semantics=("parallel",)),
        cost_estimate=cost,
    )(xt, w1t, b1_c, w2t, b2_c, w3_c, b3_c)

    # torch.squeeze(out, 1) and drop batch padding (padded rows are junk).
    return out[0, :B]


def init_params(key, critic_in_dim, hid1=64, hid2=64, out_dim=1):
    """nn.Linear-shaped params, stored as W:[in, out], b:[out] so the math is
    x @ W + b (equivalent to torch's x @ W.T + b)."""
    ks = jax.random.split(key, 6)

    def lin(kw, kb, fan_in, fan_out):
        bound = 1.0 / jnp.sqrt(fan_in)
        w = jax.random.uniform(kw, (fan_in, fan_out), jnp.float32,
                               -bound, bound)
        b = jax.random.uniform(kb, (fan_out,), jnp.float32, -bound, bound)
        return w, b

    w1, b1 = lin(ks[0], ks[1], critic_in_dim, hid1)
    w2, b2 = lin(ks[2], ks[3], hid1, hid2)
    w3, b3 = lin(ks[4], ks[5], hid2, out_dim)
    return {"w1": w1, "b1": b1, "w2": w2, "b2": b2, "w3": w3, "b3": b3}


if __name__ == "__main__":
    key = jax.random.PRNGKey(0)
    k_obs0, k_obs1, k_act0, k_act1, k_params = jax.random.split(key, 5)

    B = 8           # batch (small demo; real RL batches are much larger)
    obs_dim = 10    # per-agent observation dim
    act_dim = 4     # per-agent action dim
    n_agents = 2
    critic_in_dim = n_agents * (obs_dim + act_dim)   # 28

    obs_n = [
        jax.random.normal(k_obs0, (B, obs_dim), jnp.float32),
        jax.random.normal(k_obs1, (B, obs_dim), jnp.float32),
    ]
    act_n = [
        jax.random.normal(k_act0, (B, act_dim), jnp.float32),
        jax.random.normal(k_act1, (B, act_dim), jnp.float32),
    ]

    params = init_params(k_params, critic_in_dim)

    # Pure-JAX f32 reference of the same math.
    x = jnp.concatenate(obs_n + act_n, axis=1)
    h1 = jnp.maximum(x @ params["w1"] + params["b1"], 0.0)
    h2 = jnp.maximum(h1 @ params["w2"] + params["b2"], 0.0)
    ref = jnp.squeeze(h2 @ params["w3"] + params["b3"], axis=1)

    # Full-precision path (tight check).
    out_f32 = critic_forward(params, obs_n, act_n, compute_dtype=jnp.float32)
    jax.block_until_ready(out_f32)
    assert out_f32.shape == (B,)
    assert jnp.allclose(out_f32, ref, atol=1e-4, rtol=1e-4)

    # Default bf16-MXU path (f32 accumulation + f32 epilogue).
    # NOTE: deliberately quantizes raw obs/act inputs to bf16 before fc1.
    out_bf16 = critic_forward(params, obs_n, act_n)
    jax.block_until_ready(out_bf16)
    assert out_bf16.shape == (B,)
    assert jnp.allclose(out_bf16, ref, atol=5e-2, rtol=5e-2)

    print("KERNEL_OK")
</pallas_src>

<mosaic_0001>
module attributes {stable_mosaic.version = 11 : i64} {
  func.func @kernel(%arg0: i32, %arg1: memref<32x128xf32, #tpu.memory_space<vmem>>, %arg2: memref<64x32xf32, #tpu.memory_space<vmem>>, %arg3: memref<64x1xf32, #tpu.memory_space<vmem>>, %arg4: memref<64x64xf32, #tpu.memory_space<vmem>>, %arg5: memref<64x1xf32, #tpu.memory_space<vmem>>, %arg6: memref<64x1xf32, #tpu.memory_space<vmem>>, %arg7: memref<1x1xf32, #tpu.memory_space<vmem>>, %arg8: memref<1x128xf32, #tpu.memory_space<vmem>>) attributes {dimension_semantics = [#tpu.dimension_semantics<parallel>], iteration_bounds = array<i64: 1>, scalar_prefetch = 0 : i64, scratch_operands = 0 : i64, tpu.core_type = #tpu.core_type<tc>, window_params = [{transform_indices = @transform_0, window_bounds = array<i64: 32, 128>}, {pipeline_mode = #tpu.pipeline_mode<synchronous>, transform_indices = @transform_1, window_bounds = array<i64: 64, 32>}, {pipeline_mode = #tpu.pipeline_mode<synchronous>, transform_indices = @transform_2, window_bounds = array<i64: 64, 1>}, {pipeline_mode = #tpu.pipeline_mode<synchronous>, transform_indices = @transform_3, window_bounds = array<i64: 64, 64>}, {pipeline_mode = #tpu.pipeline_mode<synchronous>, transform_indices = @transform_4, window_bounds = array<i64: 64, 1>}, {pipeline_mode = #tpu.pipeline_mode<synchronous>, transform_indices = @transform_5, window_bounds = array<i64: 64, 1>}, {pipeline_mode = #tpu.pipeline_mode<synchronous>, transform_indices = @transform_6, window_bounds = array<i64: 1, 1>}, {transform_indices = @transform_7, window_bounds = array<i64: 1, 128>}]} {
    %c0 = arith.constant 0 : index
    %c0_0 = arith.constant 0 : index
    %0 = vector.load %arg2[%c0, %c0_0] : memref<64x32xf32, #tpu.memory_space<vmem>>, vector<64x32xf32>
    %c0_1 = arith.constant 0 : index
    %c0_2 = arith.constant 0 : index
    %1 = vector.load %arg4[%c0_1, %c0_2] : memref<64x64xf32, #tpu.memory_space<vmem>>, vector<64x64xf32>
    %c0_3 = arith.constant 0 : index
    %c0_4 = arith.constant 0 : index
    %2 = vector.load %arg3[%c0_3, %c0_4] : memref<64x1xf32, #tpu.memory_space<vmem>>, vector<64x1xf32>
    %c0_5 = arith.constant 0 : index
    %c0_6 = arith.constant 0 : index
    %3 = vector.load %arg5[%c0_5, %c0_6] : memref<64x1xf32, #tpu.memory_space<vmem>>, vector<64x1xf32>
    %c0_7 = arith.constant 0 : index
    %c0_8 = arith.constant 0 : index
    %4 = vector.load %arg6[%c0_7, %c0_8] : memref<64x1xf32, #tpu.memory_space<vmem>>, vector<64x1xf32>
    %c0_9 = arith.constant 0 : index
    %c0_10 = arith.constant 0 : index
    %5 = vector.load %arg7[%c0_9, %c0_10] : memref<1x1xf32, #tpu.memory_space<vmem>>, vector<1x1xf32>
    %c0_i32 = arith.constant 0 : i32
    %c1_i32 = arith.constant 1 : i32
    %6 = arith.muli %c0_i32, %c1_i32 : i32
    %c0_i32_11 = arith.constant 0 : i32
    %7 = arith.addi %c0_i32_11, %6 : i32
    %c128_i32 = arith.constant 128 : i32
    %8 = arith.muli %7, %c128_i32 : i32
    %9 = tpu.assume_multiple %8, 128 : i32
    %c0_12 = arith.constant 0 : index
    %10 = arith.index_cast %9 : i32 to index
    %11 = vector.load %arg1[%c0_12, %10] : memref<32x128xf32, #tpu.memory_space<vmem>>, vector<32x128xf32>
    %cst = arith.constant dense<0.000000e+00> : vector<64x128xf32>
    %12 = tpu.matmul %0, %11, %cst {dimension_numbers = #tpu.dot_dimension_numbers<[1], [0], [0], [1], [0, 0, 1, 1], [], []>} : vector<64x32xf32>, vector<32x128xf32>, vector<64x128xf32> -> vector<64x128xf32>
    %13 = vector.broadcast %2 : vector<64x1xf32> to vector<64x128xf32>
    %14 = arith.addf %12, %13 : vector<64x128xf32>
    %cst_13 = arith.constant 0.000000e+00 : f32
    %15 = vector.broadcast %cst_13 : f32 to vector<64x128xf32>
    %16 = arith.maximumf %14, %15 : vector<64x128xf32>
    %cst_14 = arith.constant dense<0.000000e+00> : vector<64x128xf32>
    %17 = tpu.matmul %1, %16, %cst_14 {dimension_numbers = #tpu.dot_dimension_numbers<[1], [0], [0], [1], [0, 0, 1, 1], [], []>} : vector<64x64xf32>, vector<64x128xf32>, vector<64x128xf32> -> vector<64x128xf32>
    %18 = vector.broadcast %3 : vector<64x1xf32> to vector<64x128xf32>
    %19 = arith.addf %17, %18 : vector<64x128xf32>
    %cst_15 = arith.constant 0.000000e+00 : f32
    %20 = vector.broadcast %cst_15 : f32 to vector<64x128xf32>
    %21 = arith.maximumf %19, %20 : vector<64x128xf32>
    %22 = vector.broadcast %4 : vector<64x1xf32> to vector<64x128xf32>
    %23 = arith.mulf %21, %22 : vector<64x128xf32>
    %cst_16 = arith.constant dense<0.000000e+00> : vector<128xf32>
    %24 = vector.multi_reduction <add>, %23, %cst_16 [0] : vector<64x128xf32> to vector<128xf32>
    %25 = vector.shape_cast %24 : vector<128xf32> to vector<1x128xf32>
    %26 = vector.broadcast %5 : vector<1x1xf32> to vector<1x128xf32>
    %27 = arith.addf %25, %26 : vector<1x128xf32>
    %c0_17 = arith.constant 0 : index
    %28 = arith.index_cast %9 : i32 to index
    %29 = vector.load %arg8[%c0_17, %28] : memref<1x128xf32, #tpu.memory_space<vmem>>, vector<1x128xf32>
    tpu.vector_store %arg8[%c0_17, %28], %27 {strides = array<i32>} : memref<1x128xf32, #tpu.memory_space<vmem>>, vector<1x128xf32>,
    %c1_i32_18 = arith.constant 1 : i32
    return
  }
  func.func @transform_0(%arg0: i32) -> (i32, i32) {
    %c0_i32 = arith.constant 0 : i32
    %c0_i32_0 = arith.constant 0 : i32
    return %c0_i32, %arg0 : i32, i32
  }
  func.func @transform_1(%arg0: i32) -> (i32, i32) {
    %c0_i32 = arith.constant 0 : i32
    %c0_i32_0 = arith.constant 0 : i32
    %c0_i32_1 = arith.constant 0 : i32
    return %c0_i32, %c0_i32_0 : i32, i32
  }
  func.func @transform_2(%arg0: i32) -> (i32, i32) {
    %c0_i32 = arith.constant 0 : i32
    %c0_i32_0 = arith.constant 0 : i32
    %c0_i32_1 = arith.constant 0 : i32
    return %c0_i32, %c0_i32_0 : i32, i32
  }
  func.func @transform_3(%arg0: i32) -> (i32, i32) {
    %c0_i32 = arith.constant 0 : i32
    %c0_i32_0 = arith.constant 0 : i32
    %c0_i32_1 = arith.constant 0 : i32
    return %c0_i32, %c0_i32_0 : i32, i32
  }
  func.func @transform_4(%arg0: i32) -> (i32, i32) {
    %c0_i32 = arith.constant 0 : i32
    %c0_i32_0 = arith.constant 0 : i32
    %c0_i32_1 = arith.constant 0 : i32
    return %c0_i32, %c0_i32_0 : i32, i32
  }
  func.func @transform_5(%arg0: i32) -> (i32, i32) {
    %c0_i32 = arith.constant 0 : i32
    %c0_i32_0 = arith.constant 0 : i32
    %c0_i32_1 = arith.constant 0 : i32
    return %c0_i32, %c0_i32_0 : i32, i32
  }
  func.func @transform_6(%arg0: i32) -> (i32, i32) {
    %c0_i32 = arith.constant 0 : i32
    %c0_i32_0 = arith.constant 0 : i32
    %c0_i32_1 = arith.constant 0 : i32
    return %c0_i32, %c0_i32_0 : i32, i32
  }
  func.func @transform_7(%arg0: i32) -> (i32, i32) {
    %c0_i32 = arith.constant 0 : i32
    %c0_i32_0 = arith.constant 0 : i32
    return %c0_i32, %arg0 : i32, i32
  }
}

</mosaic_0001>

<bundles_post_ra>
// kernel: tpu_custom_call.1
= control target key start
LH: loop header
LB: loop body
LE: loop exit
PB: predicated region body
PF: predicated region fallthrough
CT: control target
= control target key end

     0   :  { %s846_s0 = inlined_call_operand.vmem [shape: f32[32,128], index: 0, kind: input, shape index: {}]   ;;  %s847_s1 = inlined_call_operand.vmem [shape: f32[64,32], index: 1, kind: input, shape index: {}]   ;;  %s848_s2 = inlined_call_operand.vmem [shape: f32[64,1], index: 2, kind: input, shape index: {}]   ;;  %s849_s3 = inlined_call_operand.vmem [shape: f32[64,64], index: 3, kind: input, shape index: {}]   ;;  %s850_s4 = inlined_call_operand.vmem [shape: f32[64,1], index: 4, kind: input, shape index: {}]   ;;  %s851_s5 = inlined_call_operand.vmem [shape: f32[64,1], index: 5, kind: input, shape index: {}]   ;;  %s852_s6 = inlined_call_operand.<no memory space> [shape: f32[1,1], index: 6, kind: input, shape index: {}]   ;;  %s853_s7 = inlined_call_operand.hbm [shape: f32[1,128], index: 7, kind: output, shape index: {}]  }
   0x1   :  { %v12_v0 = vstv %s852_s6 }
   0x2   :  { %13 = vst [vmem:[#allocation2] sm:$0x1] %v12_v0 }
   0x3   :  { %v73_v1 = vld [vmem:[%s846_s0 + $0x18] sm:$0xff]  ;;  %v72_v2 = vld [vmem:[%s846_s0 + $0x10] sm:$0xff]  ;;  %vm114_vm0 = vcmask 261120   ;;  %v29_v3 = vld [vmem:[%s847_s1] sm:$0xff]  ;;  %v650_v4 = vmov 0  }
   0x4   :  { %560 = vmatprep.subr.mxu0 %v73_v1  ;;  %626 = vset.pattern.permute.xlu0 %v650_v4  ;;  %v71_v5 = vld [vmem:[%s846_s0 + $0x8] sm:$0xff]  ;;  %v70_v6 = vld [vmem:[%s846_s0] sm:$0xff]  ;;  %v52_v7 = vld [vmem:[%s848_s2 + $0x38] sm:$0xff] }
   0x5   :  { %561 = vmatpush3.msra.mxu0 %v73_v1  ;;  %568 = vmatprep.mubr.msk.f32.mxu0 %vm114_vm0, %v29_v3  ;;  %v50_v8 = vld [vmem:[%s848_s2 + $0x28] sm:$0xff]  ;;  %v51_v10 = vld [vmem:[%s848_s2 + $0x30] sm:$0xff]  ;;  %v49_v12 = vld [vmem:[%s848_s2 + $0x20] sm:$0xff] }
   0x6   :  { %562 = vmatprep.subr.mxu0 %v72_v2  ;;  %627 = vset.pattern.permute.xlu1 %v650_v4  ;;  %v30_v9 = vld [vmem:[%s847_s1 + $0x8] sm:$0xff]  ;;  %v31_v11 = vld [vmem:[%s847_s1 + $0x10] sm:$0xff]  ;;  %v32_v13 = vld [vmem:[%s847_s1 + $0x18] sm:$0xff] }
   0x7   :  { %563 = vmatpush3.msra.mxu0 %v72_v2  ;;  %111 = vperm.xlu0 %626, %v52_v7   ;;  %v48_v14 = vld [vmem:[%s848_s2 + $0x18] sm:$0xff]  ;;  %v33_v15 = vld [vmem:[%s847_s1 + $0x20] sm:$0xff]  ;;  %v47_v16 = vld [vmem:[%s848_s2 + $0x10] sm:$0xff] }
   0x8   :  { %564 = vmatprep.subr.mxu0 %v71_v5  ;;  %101 = vperm.xlu1 %627, %v50_v8  }
   0x9   :  { %565 = vmatpush3.msra.mxu0 %v71_v5 }
   0xa   :  { %566 = vmatprep.subr.mxu0 %v70_v6 }
   0xb   :  { %567 = vmatpush3.msra.mxu0 %v70_v6  ;;  %106 = vperm.xlu0 %626, %v51_v10  }
   0xc   :  { %569 = vmatmul.mubr.msk.f32.vlgmr.msra.gmra.mxu0 %vm114_vm0, %v30_v9  ;;  %96 = vperm.xlu1 %627, %v49_v12  }
   0xd   :  { %571 = vmatprep.mubr.msk.f32.mxu0 %vm114_vm0, %v31_v11 }
   0xe   :  { %14 = vsyncpa [#allocation4], 0  ;;  %v34_v17 = vld [vmem:[%s847_s1 + $0x28] sm:$0xff]  ;;  %v35_v19 = vld [vmem:[%s847_s1 + $0x30] sm:$0xff]  ;;  %vm292_vm1 = vcmask 523264  }
   0xf   :  { %91 = vperm.xlu0 %626, %v48_v14   ;;  %v46_v18 = vld [vmem:[%s848_s2 + $0x8] sm:$0xff]  ;;  %v45_v20 = vld [vmem:[%s848_s2] sm:$0xff]  ;;  %v36_v21 = vld [vmem:[%s847_s1 + $0x38] sm:$0xff] }
  0x10   :  { %572 = vmatmul.mubr.msk.f32.gmra.mxu0 %vm114_vm0, %v32_v13  ;;  %86 = vperm.xlu1 %627, %v47_v16   ;;  %v53_v22 = vld [vmem:[%s850_s4] sm:$0xff]  ;;  %v54_v23 = vld [vmem:[%s850_s4 + $0x8] sm:$0xff]  ;;  %v55_v24 = vld [vmem:[%s850_s4 + $0x10] sm:$0xff] }
  0x11   :  { %574 = vmatprep.mubr.msk.f32.mxu0 %vm114_vm0, %v33_v15  ;;  %v56_v25 = vld [vmem:[%s850_s4 + $0x18] sm:$0xff]  ;;  %v61_v26 = vld [vmem:[%s851_s5] sm:$0xff]  ;;  %v62_v27 = vld [vmem:[%s851_s5 + $0x8] sm:$0xff] }
  0x12   :  { %v57_v28 = vld [vmem:[%s850_s4 + $0x20] sm:$0xff]  ;;  %v63_v29 = vld [vmem:[%s851_s5 + $0x10] sm:$0xff]  ;;  %v58_v30 = vld [vmem:[%s850_s4 + $0x28] sm:$0xff] }
  0x13   :  { %81 = vperm.xlu0 %626, %v46_v18   ;;  %v64_v31 = vld [vmem:[%s851_s5 + $0x18] sm:$0xff]  ;;  %v59_v32 = vld [vmem:[%s850_s4 + $0x30] sm:$0xff]  ;;  %v65_v33 = vld [vmem:[%s851_s5 + $0x20] sm:$0xff] }
  0x14   :  { %575 = vmatmul.mubr.msk.f32.gmra.mxu0 %vm114_vm0, %v34_v17  ;;  %76 = vperm.xlu1 %627, %v45_v20   ;;  %v60_v34 = vld [vmem:[%s850_s4 + $0x38] sm:$0xff]  ;;  %v66_v35 = vld [vmem:[%s851_s5 + $0x28] sm:$0xff]  ;;  %v67_v36 = vld [vmem:[%s851_s5 + $0x30] sm:$0xff] }
  0x15   :  { %577 = vmatprep.mubr.msk.f32.mxu0 %vm114_vm0, %v35_v19  ;;  %v68_v37 = vld [vmem:[%s851_s5 + $0x38] sm:$0xff]  ;;  %v69_v38 = vld [vmem:[#allocation2] sm:$0x1]  ;;  %v39_v40 = vld [vmem:[%s849_s3 + $0x10] sm:$0xff] }
  0x16   :  { %v37_v39 = vld [vmem:[%s849_s3] sm:$0xff]  ;;  %599 = vmatprep.mubr.msk.f32.mxu1 %vm292_vm1, %v39_v40  ;;  %v38_v9 = vld [vmem:[%s849_s3 + $0x8] sm:$0xff]  ;;  %v40_v10 = vld [vmem:[%s849_s3 + $0x18] sm:$0xff] }
  0x17   :  { %254 = vperm.xlu0 %626, %v53_v22   ;;  %v41_v11 = vld [vmem:[%s849_s3 + $0x20] sm:$0xff]  ;;  %v42_v12 = vld [vmem:[%s849_s3 + $0x28] sm:$0xff]  ;;  %v43_v13 = vld [vmem:[%s849_s3 + $0x30] sm:$0xff] }
  0x18   :  { %578 = vmatmul.mubr.msk.f32.gmra.mxu0 %vm114_vm0, %v36_v21  ;;  %259 = vperm.xlu1 %627, %v54_v23   ;;  %v44_v14 = vld [vmem:[%s849_s3 + $0x38] sm:$0xff]  ;;  %s651_s3 = smov [#allocation3]  }
  0x19   :  { %596 = vmatprep.mubr.msk.f32.mxu0 %vm292_vm1, %v37_v39  ;;  %s508_s6 = sshll.u32 %s651_s3, 4  ;;  %s509_s6 = int_to_ptr.vmem [resolvable:$true] %s508_s6 }
  0x1a   :  { %s628_s10 = scalar_lea.vmem %s509_s6, 16  ;;  %s632_s11 = scalar_lea.vmem %s509_s6, 32 }
  0x1b   :  { %264 = vperm.xlu0 %626, %v55_v24   ;;  %p629_p0 = scmp.ne.s32.totalorder %s509_s6, %s628_s10  ;;  %p633_p1 = scmp.lt.s32.totalorder %s509_s6, %s509_s6 }
  0x1c   :  { %269 = vperm.xlu1 %627, %v56_v25   ;;  %p634_p2 = scmp.lt.s32.totalorder %s632_s11, %s628_s10 }
  0x1e   :  { %p635_p3 = por %p634_p2, %p633_p1 }
  0x1f   :  { %432 = vperm.xlu0 %626, %v61_v26  }
  0x20   :  { %437 = vperm.xlu1 %627, %v62_v27   ;;  %p636_p4 = pnand %p635_p3, %p629_p0 }
  0x23   :  { %274 = vperm.xlu0 %626, %v57_v28  }
  0x24   :  { %442 = vperm.xlu1 %627, %v63_v29  }
  0x27   :  { %279 = vperm.xlu0 %626, %v58_v30  }
  0x28   :  { %447 = vperm.xlu1 %627, %v64_v31  }
  0x2b   :  { %284 = vperm.xlu0 %626, %v59_v32  }
  0x2c   :  { %452 = vperm.xlu1 %627, %v65_v33  }
  0x2f   :  { %289 = vperm.xlu0 %626, %v60_v34  }
  0x30   :  { %457 = vperm.xlu1 %627, %v66_v35  }
  0x33   :  { %462 = vperm.xlu0 %626, %v67_v36  }
  0x34   :  { %467 = vperm.xlu1 %627, %v68_v37  }
  0x37   :  { %493 = vperm.xlu0 %626, %v69_v38  }
  0x82   :  { %v112_v43 = vpop.permute.xlu0 %111 }
  0x83   :  { %v102_v45 = vpop.permute.xlu1 %101 }
  0x86   :  { %v107_v48 = vpop.permute.xlu0 %106 }
  0x87   :  { %v97_v50 = vpop.permute.xlu1 %96 }
  0x8a   :  { %v92_v57 = vpop.permute.xlu0 %91 }
  0x8b   :  { %v87_v60 = vpop.permute.xlu1 %86 }
  0x8e   :  { %v82_v1 = vpop.permute.xlu0 %81 }
  0x8f   :  { %v77_v4 = vpop.permute.xlu1 %76 }
  0x92   :  { %v255_v15 = vpop.permute.xlu0 %254 }
  0x93   :  { %v260_v16 = vpop.permute.xlu1 %259 }
  0x96   :  { %v265_v17 = vpop.permute.xlu0 %264 }
  0x97   :  { %v270_v18 = vpop.permute.xlu1 %269 }
  0x9a   :  { %v433_v19 = vpop.permute.xlu0 %432 }
  0x9b   :  { %v438_v20 = vpop.permute.xlu1 %437 }
  0x9e   :  { %v275_v21 = vpop.permute.xlu0 %274 }
  0x9f   :  { %v443_v22 = vpop.permute.xlu1 %442 }
  0xa2   :  { %v280_v23 = vpop.permute.xlu0 %279 }
  0xa3   :  { %v448_v24 = vpop.permute.xlu1 %447 }
  0xa6   :  { %v285_v34 = vpop.permute.xlu0 %284 }
  0xa7   :  { %v453_v38 = vpop.permute.xlu1 %452 }
  0xcc   :  { %v570_v41 = vpop.f32.mrf.mxu0 }
  0xcd   :  { %v211_v2 = vadd.f32 %v570_v41, %v82_v1 }
  0xce   :  { %v205_v42 = vpop.f32.mrf.mxu0 }
  0xcf   :  { %v206_v5 = vadd.f32 %v205_v42, %v77_v4  ;;  %v245_v7 = vmax.f32 %v211_v2, 0.0 }
  0xd0   :  { %v573_v44 = vpop.f32.mrf.mxu0 }
  0xd1   :  { %v221_v61 = vadd.f32 %v573_v44, %v92_v57  ;;  %v244_v8 = vmax.f32 %v206_v5, 0.0  ;;  %v496_v5 = vlaneseq }
  0xd2   :  { %v215_v46 = vpop.f32.mrf.mxu0 }
  0xd3   :  { %v216_v63 = vadd.f32 %v215_v46, %v87_v60  ;;  %v247_v3 = vmax.f32 %v221_v61, 0.0 }
  0xd4   :  { %v576_v47 = vpop.f32.mrf.mxu0 }
  0xd5   :  { %v231_v54 = vadd.f32 %v576_v47, %v102_v45  ;;  %v246_v6 = vmax.f32 %v216_v63, 0.0 }
  0xd6   :  { %v225_v49 = vpop.f32.mrf.mxu0 }
  0xd7   :  { %v226_v58 = vadd.f32 %v225_v49, %v97_v50  ;;  %v249_v62 = vmax.f32 %v231_v54, 0.0  ;;  %v290_v49 = vpop.permute.xlu0 %289 }
  0xd8   :  { %v579_v51 = vpop.f32.mrf.mxu0 }
  0xd9   :  { %v241_v52 = vadd.f32 %v579_v51, %v112_v43  ;;  %v248_v0 = vmax.f32 %v226_v58, 0.0 }
  0xda   :  { %v235_v53 = vpop.f32.mrf.mxu0 }
  0xdb   :  { %v251_v55 = vmax.f32 %v241_v52, 0.0  ;;  %v236_v56 = vadd.f32 %v235_v53, %v107_v48  ;;  %v463_v63 = vpop.permute.xlu0 %462 }
  0xdd   :  { %v250_v59 = vmax.f32 %v236_v56, 0.0  ;;  %580 = vmatprep.subr.mxu0 %v251_v55  ;;  %608 = vmatprep.subr.mxu1 %v251_v55  ;;  %v458_v56 = vpop.permute.xlu1 %457 }
  0xde   :  { %581 = vmatpush3.msra.mxu0 %v251_v55  ;;  %616 = vmatpush3.msra.mxu1 %v251_v55 }
  0xdf   :  { %582 = vmatprep.subr.mxu0 %v250_v59  ;;  %609 = vmatprep.subr.mxu1 %v250_v59 }
  0xe0   :  { %583 = vmatpush3.msra.mxu0 %v250_v59  ;;  %617 = vmatpush3.msra.mxu1 %v250_v59 }
  0xe1   :  { %584 = vmatprep.subr.mxu0 %v249_v62  ;;  %610 = vmatprep.subr.mxu1 %v249_v62  ;;  %v468_v2 = vpop.permute.xlu1 %467 }
  0xe2   :  { %585 = vmatpush3.msra.mxu0 %v249_v62  ;;  %618 = vmatpush3.msra.mxu1 %v249_v62 }
  0xe3   :  { %586 = vmatprep.subr.mxu0 %v248_v0  ;;  %611 = vmatprep.subr.mxu1 %v248_v0 }
  0xe4   :  { %587 = vmatpush3.msra.mxu0 %v248_v0  ;;  %619 = vmatpush3.msra.mxu1 %v248_v0 }
  0xe5   :  { %588 = vmatprep.subr.mxu0 %v247_v3  ;;  %612 = vmatprep.subr.mxu1 %v247_v3 }
  0xe6   :  { %589 = vmatpush3.msra.mxu0 %v247_v3  ;;  %620 = vmatpush3.msra.mxu1 %v247_v3 }
  0xe7   :  { %590 = vmatprep.subr.mxu0 %v246_v6  ;;  %613 = vmatprep.subr.mxu1 %v246_v6 }
  0xe8   :  { %591 = vmatpush3.msra.mxu0 %v246_v6  ;;  %621 = vmatpush3.msra.mxu1 %v246_v6 }
  0xe9   :  { %592 = vmatprep.subr.mxu0 %v245_v7  ;;  %614 = vmatprep.subr.mxu1 %v245_v7 }
  0xea   :  { %593 = vmatpush3.msra.mxu0 %v245_v7  ;;  %622 = vmatpush3.msra.mxu1 %v245_v7 }
  0xeb   :  { %594 = vmatprep.subr.mxu0 %v244_v8  ;;  %615 = vmatprep.subr.mxu1 %v244_v8 }
  0xec   :  { %595 = vmatpush3.msra.mxu0 %v244_v8  ;;  %623 = vmatpush3.msra.mxu1 %v244_v8  ;;  %v497_v8 = vshrl.u32 %v496_v5, 7 }
  0xed   :  { %597 = vmatmul.mubr.msk.f32.vlgmr.msra.gmra.mxu0 %vm292_vm1, %v38_v9  ;;  %600 = vmatmul.mubr.msk.f32.vlgmr.msra.gmra.mxu1 %vm292_vm1, %v40_v10 }
  0xee   :  { %602 = vmatprep.mubr.msk.f32.mxu1 %vm292_vm1, %v41_v11  ;;  %v498_v11 = vsub.s32 0, %v497_v8 }
  0xf1   :  { %603 = vmatmul.mubr.msk.f32.gmra.mxu1 %vm292_vm1, %v42_v12 }
  0xf2   :  { %605 = vmatprep.mubr.msk.f32.mxu1 %vm292_vm1, %v43_v13  ;;  %v494_v13 = vpop.permute.xlu0 %493 }
  0xf5   :  { %606 = vmatmul.mubr.msk.f32.gmra.mxu1 %vm292_vm1, %v44_v14 }
 0x1ad   :  { %v598_v25 = vpop.f32.mrf.mxu0  ;;  %v601_v26 = vpop.f32.mrf.mxu1 }
 0x1ae   :  { %v389_v27 = vadd.f32 %v598_v25, %v260_v16  ;;  %v399_v28 = vadd.f32 %v601_v26, %v270_v18 }
 0x1af   :  { %v383_v29 = vpop.f32.mrf.mxu0  ;;  %v393_v30 = vpop.f32.mrf.mxu1 }
 0x1b0   :  { %v423_v31 = vmax.f32 %v389_v27, 0.0  ;;  %v384_v32 = vadd.f32 %v383_v29, %v255_v15  ;;  %v394_v33 = vadd.f32 %v393_v30, %v265_v17  ;;  %v425_v39 = vmax.f32 %v399_v28, 0.0 }
 0x1b1   :  { %v604_v35 = vpop.f32.mrf.mxu1  ;;  %v499_v15 = vrot.slane %v494_v13, %v498_v11 }
 0x1b2   :  { %v422_v36 = vmax.f32 %v384_v32, 0.0  ;;  %v424_v37 = vmax.f32 %v394_v33, 0.0  ;;  %v471_v41 = vmul.f32 %v438_v20, %v423_v31  ;;  %v409_v43 = vadd.f32 %v604_v35, %v280_v23 }
 0x1b3   :  { %v403_v40 = vpop.f32.mrf.mxu1  ;;  %v473_v50 = vmul.f32 %v448_v24, %v425_v39 }
 0x1b4   :  { %v470_v42 = vmul.f32 %v433_v19, %v422_v36  ;;  %v404_v44 = vadd.f32 %v403_v40, %v275_v21  ;;  %v472_v47 = vmul.f32 %v443_v22, %v424_v37  ;;  %v427_v53 = vmax.f32 %v409_v43, 0.0 }
 0x1b5   :  { %v607_v45 = vpop.f32.mrf.mxu1 }
 0x1b6   :  { %v478_v46 = vadd.f32 %v471_v41, %v470_v42  ;;  %v426_v48 = vmax.f32 %v404_v44, 0.0  ;;  %v419_v54 = vadd.f32 %v607_v45, %v290_v49  ;;  %v475_v60 = vmul.f32 %v458_v56, %v427_v53 }
 0x1b7   :  { %v413_v51 = vpop.f32.mrf.mxu1 }
 0x1b8   :  { %v479_v52 = vadd.f32 %v478_v46, %v472_v47  ;;  %v414_v55 = vadd.f32 %v413_v51, %v285_v34  ;;  %v474_v57 = vmul.f32 %v453_v38, %v426_v48  ;;  %v429_v62 = vmax.f32 %v419_v54, 0.0 }
 0x1ba   :  { %v480_v58 = vadd.f32 %v479_v52, %v473_v50  ;;  %v428_v59 = vmax.f32 %v414_v55, 0.0  ;;  %v477_v3 = vmul.f32 %v468_v2, %v429_v62 }
 0x1bc   :  { %v481_v61 = vadd.f32 %v480_v58, %v474_v57  ;;  %v476_v0 = vmul.f32 %v463_v63, %v428_v59 }
 0x1be   :  { %v482_v1 = vadd.f32 %v481_v61, %v475_v60 }
 0x1c0   :  { %v483_v4 = vadd.f32 %v482_v1, %v476_v0 }
 0x1c2   :  { %v484_v6 = vadd.f32 %v483_v4, %v477_v3 }
 0x1c4   :  { %v485_v7 = vrot.slane %v484_v6, 4 }
 0x1c6   :  { %v486_v9 = vadd.f32 %v485_v7, %v484_v6 }
 0x1c8   :  { %v487_v10 = vrot.slane %v486_v9, 2 }
 0x1ca   :  { %v488_v12 = vadd.f32 %v487_v10, %v486_v9 }
 0x1cc   :  { %v489_v14 = vrot.slane %v488_v12, 1 }
 0x1ce   :  { %v490_v16 = vadd.f32 %v489_v14, %v488_v12 }
 0x1d0   :  { %v500_v17 = vadd.f32 %v499_v15, %v490_v16 }
 0x1d2   :  { %501 = vst [vmem:[#allocation3] sm:$0x1] %v500_v17 }
 0x1d3   :  { %639 = shalt.err (!%p636_p4)
}
 0x1d4   :  { %511 = dma.vmem_to_hbm [thread:$0]  %s509_s6, 16, %s853_s7, [#allocation4]  }
 0x1d5   :  { %648 = dma.done.wait [#allocation4], 16  }
 0x1d6   :  { %649 = vsyncadd [#allocation4], 4294967280 }
 0x1d7   :  { %515 = vsyncpa [#allocation4], 1 }

</bundles_post_ra>
